<compile_context>
chip_gen: v6e
topology: v6e:2x2x1
jax: 0.10.0
libtpu: 0.0.40
codegen_flags: <defaults>
</compile_context>

<pallas_src>
import functools

import jax
import jax.numpy as jnp
from jax import lax
from jax.experimental import pallas as pl
from jax.experimental.pallas import tpu as pltpu


# ---------------------------------------------------------------------------
# Kernels
# ---------------------------------------------------------------------------

def _layernorm_kernel(x_ref, g_ref, b_ref, o_ref, *, inv_eps):
    # x_ref: (TILE_ROWS, DIM); g_ref/b_ref: (1, DIM)  -- compute in f32.
    x = x_ref[...].astype(jnp.float32)
    mean = jnp.mean(x, axis=-1, keepdims=True)
    xc = x - mean
    var = jnp.mean(xc * xc, axis=-1, keepdims=True)            # unbiased=False
    # std.clamp(min=eps): 1 / max(sqrt(var), eps) == min(rsqrt(var), 1/eps)
    inv_std = jnp.minimum(lax.rsqrt(var), inv_eps)
    gamma = g_ref[...].astype(jnp.float32)
    beta = b_ref[...].astype(jnp.float32)
    o_ref[...] = (xc * inv_std * gamma + beta).astype(o_ref.dtype)


def _layernorm_folded_kernel(x_ref, seg_ref, g_ref, b_ref, o_ref,
                             *, inv_dim, inv_eps):
    # x_ref: (TILE_ROWS, LANES) where LANES = fold*dim == 128 (lane-dense).
    # seg_ref: (LANES, LANES) block-diagonal ones -> segmented sum broadcast
    # back to every lane of its segment via one MXU matmul (MXU is idle here).
    x = x_ref[...].astype(jnp.float32)
    seg = seg_ref[...]
    dot = functools.partial(jnp.dot, preferred_element_type=jnp.float32,
                            precision=jax.lax.Precision.HIGHEST)
    mean = dot(x, seg) * inv_dim                  # per-lane segment mean
    xc = x - mean
    var = dot(xc * xc, seg) * inv_dim             # unbiased=False, two-pass
    inv_std = jnp.minimum(lax.rsqrt(var), inv_eps)
    o_ref[...] = (xc * inv_std * g_ref[...] + b_ref[...]).astype(o_ref.dtype)


# ---------------------------------------------------------------------------
# Sizing helpers
# ---------------------------------------------------------------------------

def _sublane_multiple(dtype):
    # Sublane packing granularity: 8 for 32-bit, 16 for 16-bit, 32 for 8-bit.
    itemsize = jnp.dtype(dtype).itemsize
    if itemsize >= 4:
        return 8
    if itemsize == 2:
        return 16
    return 32


def _vmem_limit_bytes():
    # Generation-aware scoped-VMEM limit: ~75% of physical, capped at 96 MiB
    # (v5e/v6e: 128 MiB -> 96 MiB; v7x: 64 MiB -> 48 MiB). Conservative
    # fallback if the query is unavailable.
    cap = 64 * 1024 * 1024
    try:
        info = pltpu.get_tpu_info()
        cap = int(getattr(info, "vmem_capacity_bytes", cap))
    except Exception:
        pass
    return int(max(16 * 1024 * 1024, min(cap * 3 // 4, 96 * 1024 * 1024)))


def _pick_tile_rows(rows, width, in_itemsize, out_itemsize, row_mult, vmem_limit):
    """Rows per block for a (rows, width) view normalized along `width`."""
    if rows <= row_mult:
        return max(1, rows)          # single block == full row extent
    # Conservative VMEM per row: double-buffered in/out blocks + ~3 full-tile
    # f32 temporaries inside the kernel.
    vmem_per_row = width * (2 * in_itemsize + 2 * out_itemsize + 3 * 4)
    vmem_rows = max(row_mult, (vmem_limit * 3 // 4) // max(1, vmem_per_row))
    # Stream ~8 MiB of x per block, measured in the input's actual dtype.
    stream_rows = max(row_mult, (8 * 1024 * 1024) // max(1, width * in_itemsize))
    t = min(vmem_rows, stream_rows)
    t = max(row_mult, (t // row_mult) * row_mult)
    # Enough grid steps for steady-state pipelining (and both v7x TCs):
    # aim for >= 8 steps when rows permit, else >= 2.
    if rows >= 8 * row_mult:
        cap = -(-rows // 8)                                   # ceil(rows/8)
        cap = ((cap + row_mult - 1) // row_mult) * row_mult
        t = min(t, cap)
    else:
        t = min(t, max(row_mult, ((rows // 2) // row_mult) * row_mult))
    return t


# ---------------------------------------------------------------------------
# Wrappers
# ---------------------------------------------------------------------------

def _layer_norm_plain(x2, gamma, beta, eps, out_dtype, row_mult, vmem_limit):
    rows, dim = x2.shape
    g2 = gamma.reshape(1, dim)
    b2 = beta.reshape(1, dim)
    in_isz = jnp.dtype(x2.dtype).itemsize
    out_isz = jnp.dtype(out_dtype).itemsize
    tile = _pick_tile_rows(rows, dim, in_isz, out_isz, row_mult, vmem_limit)
    grid = (pl.cdiv(rows, tile),)     # trailing partial block masked by Pallas

    return pl.pallas_call(
        functools.partial(_layernorm_kernel, inv_eps=float(1.0 / eps)),
        out_shape=jax.ShapeDtypeStruct((rows, dim), out_dtype),
        grid_spec=pltpu.PrefetchScalarGridSpec(
            num_scalar_prefetch=0,
            grid=grid,
            in_specs=[
                pl.BlockSpec((tile, dim), lambda i: (i, 0)),
                pl.BlockSpec((1, dim), lambda i: (0, 0)),
                pl.BlockSpec((1, dim), lambda i: (0, 0)),
            ],
            out_specs=pl.BlockSpec((tile, dim), lambda i: (i, 0)),
        ),
        compiler_params=pltpu.CompilerParams(
            dimension_semantics=("parallel",),
            vmem_limit_bytes=vmem_limit,
        ),
    )(x2, g2, b2)


def _layer_norm_folded(x2, gamma, beta, eps, fold, out_dtype, row_mult,
                       vmem_limit):
    rows, dim = x2.shape
    lanes = fold * dim                         # == 128 (lane-dense blocks)
    rows_f = rows // fold
    xf = x2.reshape(rows_f, lanes)

    # Block-diagonal segment matrix: S[i, j] = 1 iff i and j belong to the
    # same length-`dim` segment of the lane axis.
    lane = jnp.arange(lanes)
    seg = (lane[:, None] // dim == lane[None, :] // dim).astype(jnp.float32)
    g = jnp.tile(gamma.astype(jnp.float32).reshape(-1), fold).reshape(1, lanes)
    b = jnp.tile(beta.astype(jnp.float32).reshape(-1), fold).reshape(1, lanes)

    in_isz = jnp.dtype(xf.dtype).itemsize
    out_isz = jnp.dtype(out_dtype).itemsize
    tile = _pick_tile_rows(rows_f, lanes, in_isz, out_isz, row_mult, vmem_limit)
    grid = (pl.cdiv(rows_f, tile),)

    out = pl.pallas_call(
        functools.partial(_layernorm_folded_kernel,
                          inv_dim=float(1.0 / dim), inv_eps=float(1.0 / eps)),
        out_shape=jax.ShapeDtypeStruct((rows_f, lanes), out_dtype),
        grid_spec=pltpu.PrefetchScalarGridSpec(
            num_scalar_prefetch=0,
            grid=grid,
            in_specs=[
                pl.BlockSpec((tile, lanes), lambda i: (i, 0)),
                pl.BlockSpec((lanes, lanes), lambda i: (0, 0)),
                pl.BlockSpec((1, lanes), lambda i: (0, 0)),
                pl.BlockSpec((1, lanes), lambda i: (0, 0)),
            ],
            out_specs=pl.BlockSpec((tile, lanes), lambda i: (i, 0)),
        ),
        compiler_params=pltpu.CompilerParams(
            dimension_semantics=("parallel",),
            vmem_limit_bytes=vmem_limit,
        ),
    )(xf, seg, g, b)
    return out.reshape(rows, dim)


def layer_norm(x, gamma, beta, eps=1e-5):
    # Mirror torch semantics: non-floating inputs are cast to float32.
    if not jnp.issubdtype(x.dtype, jnp.floating):
        x = x.astype(jnp.float32)
    out_dtype = jnp.result_type(x.dtype, gamma.dtype, beta.dtype)

    orig_shape = x.shape
    dim = orig_shape[-1]
    rows = 1
    for s in orig_shape[:-1]:
        rows *= s
    x2 = x.reshape(rows, dim)

    row_mult = _sublane_multiple(x2.dtype)
    vmem_limit = _vmem_limit_bytes()

    # Lane-dense fold for small dims (dim divides 128): fold 128//dim rows
    # into the lane axis so loads/stores use all 128 lanes.
    fold = 128 // dim if (0 < dim < 128 and 128 % dim == 0) else 1
    if fold > 1 and rows >= fold and rows % fold == 0:
        out = _layer_norm_folded(x2, gamma, beta, eps, fold, out_dtype,
                                 row_mult, vmem_limit)
    else:
        # TODO(synk): dims that neither divide nor are a multiple of 128 still
        # take the masked-partial-store path; fold via a padded lane layout if
        # such shapes become hot.
        out = _layer_norm_plain(x2, gamma, beta, eps, out_dtype,
                                row_mult, vmem_limit)
    return out.reshape(orig_shape)


def reference_layer_norm(x, gamma, beta, eps=1e-5):
    if not jnp.issubdtype(x.dtype, jnp.floating):
        x = x.astype(jnp.float32)
    mean = jnp.mean(x, axis=-1, keepdims=True)
    var = jnp.mean((x - mean) ** 2, axis=-1, keepdims=True)
    std = jnp.maximum(jnp.sqrt(var), eps)
    return gamma * ((x - mean) / std) + beta


if __name__ == "__main__":
    key = jax.random.PRNGKey(0)
    batch, seq, hidden = 2, 8, 32
    x = jax.random.normal(key, (batch, seq, hidden), dtype=jnp.float32)

    # Parameters deterministically initialized as in the module's __init__.
    gamma = jnp.ones((hidden,), dtype=jnp.float32)
    beta = jnp.zeros((hidden,), dtype=jnp.float32)

    out = layer_norm(x, gamma, beta)
    out = jax.block_until_ready(out)

    ref = reference_layer_norm(x, gamma, beta)
    assert out.shape == x.shape
    assert jnp.allclose(out, ref, atol=1e-5, rtol=1e-5)

    # Also exercise the plain (dim multiple of 128, lane-dense) path once.
    hidden2 = 128
    x2 = jax.random.normal(jax.random.PRNGKey(1), (batch, seq, hidden2),
                           dtype=jnp.float32)
    gamma2 = jnp.ones((hidden2,), dtype=jnp.float32)
    beta2 = jnp.zeros((hidden2,), dtype=jnp.float32)
    out2 = jax.block_until_ready(layer_norm(x2, gamma2, beta2))
    ref2 = reference_layer_norm(x2, gamma2, beta2)
    assert jnp.allclose(out2, ref2, atol=1e-5, rtol=1e-5)

    print("KERNEL_OK")
</pallas_src>

<mosaic_0001>
module attributes {stable_mosaic.version = 11 : i64} {
  func.func @_layernorm_folded_kernel(%arg0: i32, %arg1: memref<4x128xf32, #tpu.memory_space<vmem>>, %arg2: memref<128x128xf32, #tpu.memory_space<vmem>>, %arg3: memref<1x128xf32, #tpu.memory_space<vmem>>, %arg4: memref<1x128xf32, #tpu.memory_space<vmem>>, %arg5: memref<4x128xf32, #tpu.memory_space<vmem>>) attributes {dimension_semantics = [#tpu.dimension_semantics<parallel>], iteration_bounds = array<i64: 1>, scalar_prefetch = 0 : i64, scratch_operands = 0 : i64, tpu.core_type = #tpu.core_type<tc>, window_params = [{transform_indices = @transform_0, window_bounds = array<i64: 4, 128>}, {pipeline_mode = #tpu.pipeline_mode<synchronous>, transform_indices = @transform_1, window_bounds = array<i64: 128, 128>}, {pipeline_mode = #tpu.pipeline_mode<synchronous>, transform_indices = @transform_2, window_bounds = array<i64: 1, 128>}, {pipeline_mode = #tpu.pipeline_mode<synchronous>, transform_indices = @transform_3, window_bounds = array<i64: 1, 128>}, {transform_indices = @transform_4, window_bounds = array<i64: 4, 128>}]} {
    %c0 = arith.constant 0 : index
    %c0_0 = arith.constant 0 : index
    %0 = vector.load %arg1[%c0, %c0_0] : memref<4x128xf32, #tpu.memory_space<vmem>>, vector<4x128xf32>
    %c0_1 = arith.constant 0 : index
    %c0_2 = arith.constant 0 : index
    %1 = vector.load %arg2[%c0_1, %c0_2] : memref<128x128xf32, #tpu.memory_space<vmem>>, vector<128x128xf32>
    %cst = arith.constant dense<0.000000e+00> : vector<4x128xf32>
    %2 = tpu.matmul %0, %1, %cst {dimension_numbers = #tpu.dot_dimension_numbers<[1], [0], [0], [1], [0, 0, 1, 1], [], []>, precision = #tpu.contract_precision<fp32>} : vector<4x128xf32>, vector<128x128xf32>, vector<4x128xf32> -> vector<4x128xf32>
    %cst_3 = arith.constant 3.125000e-02 : f32
    %3 = vector.broadcast %cst_3 : f32 to vector<4x128xf32>
    %4 = arith.mulf %2, %3 : vector<4x128xf32>
    %5 = arith.subf %0, %4 : vector<4x128xf32>
    %6 = arith.mulf %5, %5 : vector<4x128xf32>
    %cst_4 = arith.constant dense<0.000000e+00> : vector<4x128xf32>
    %7 = tpu.matmul %6, %1, %cst_4 {dimension_numbers = #tpu.dot_dimension_numbers<[1], [0], [0], [1], [0, 0, 1, 1], [], []>, precision = #tpu.contract_precision<fp32>} : vector<4x128xf32>, vector<128x128xf32>, vector<4x128xf32> -> vector<4x128xf32>
    %cst_5 = arith.constant 3.125000e-02 : f32
    %8 = vector.broadcast %cst_5 : f32 to vector<4x128xf32>
    %9 = arith.mulf %7, %8 : vector<4x128xf32>
    %10 = math.rsqrt %9 : vector<4x128xf32>
    %cst_6 = arith.constant 1.000000e+05 : f32
    %11 = vector.broadcast %cst_6 : f32 to vector<4x128xf32>
    %12 = arith.minimumf %10, %11 : vector<4x128xf32>
    %13 = arith.mulf %5, %12 : vector<4x128xf32>
    %c0_7 = arith.constant 0 : index
    %c0_8 = arith.constant 0 : index
    %14 = vector.load %arg3[%c0_7, %c0_8] : memref<1x128xf32, #tpu.memory_space<vmem>>, vector<1x128xf32>
    %15 = vector.broadcast %14 : vector<1x128xf32> to vector<4x128xf32>
    %16 = arith.mulf %13, %15 : vector<4x128xf32>
    %c0_9 = arith.constant 0 : index
    %c0_10 = arith.constant 0 : index
    %17 = vector.load %arg4[%c0_9, %c0_10] : memref<1x128xf32, #tpu.memory_space<vmem>>, vector<1x128xf32>
    %18 = vector.broadcast %17 : vector<1x128xf32> to vector<4x128xf32>
    %19 = arith.addf %16, %18 : vector<4x128xf32>
    %c0_11 = arith.constant 0 : index
    %c0_12 = arith.constant 0 : index
    %20 = vector.load %arg5[%c0_11, %c0_12] : memref<4x128xf32, #tpu.memory_space<vmem>>, vector<4x128xf32>
    tpu.vector_store %arg5[%c0_11, %c0_12], %19 {strides = array<i32>} : memref<4x128xf32, #tpu.memory_space<vmem>>, vector<4x128xf32>,
    return
  }
  func.func @transform_0(%arg0: i32) -> (i32, i32) {
    %c0_i32 = arith.constant 0 : i32
    %c0_i32_0 = arith.constant 0 : i32
    return %arg0, %c0_i32 : i32, i32
  }
  func.func @transform_1(%arg0: i32) -> (i32, i32) {
    %c0_i32 = arith.constant 0 : i32
    %c0_i32_0 = arith.constant 0 : i32
    %c0_i32_1 = arith.constant 0 : i32
    return %c0_i32, %c0_i32_0 : i32, i32
  }
  func.func @transform_2(%arg0: i32) -> (i32, i32) {
    %c0_i32 = arith.constant 0 : i32
    %c0_i32_0 = arith.constant 0 : i32
    %c0_i32_1 = arith.constant 0 : i32
    return %c0_i32, %c0_i32_0 : i32, i32
  }
  func.func @transform_3(%arg0: i32) -> (i32, i32) {
    %c0_i32 = arith.constant 0 : i32
    %c0_i32_0 = arith.constant 0 : i32
    %c0_i32_1 = arith.constant 0 : i32
    return %c0_i32, %c0_i32_0 : i32, i32
  }
  func.func @transform_4(%arg0: i32) -> (i32, i32) {
    %c0_i32 = arith.constant 0 : i32
    %c0_i32_0 = arith.constant 0 : i32
    return %arg0, %c0_i32 : i32, i32
  }
}

</mosaic_0001>

<bundles_post_ra>
// kernel: tpu_custom_call.1
= control target key start
LH: loop header
LB: loop body
LE: loop exit
PB: predicated region body
PF: predicated region fallthrough
CT: control target
= control target key end

     0   :  { %9 = vsyncpa [#allocation3], 0  ;;  %s2767_s0 = inlined_call_operand.hbm [shape: f32[4,128], index: 0, kind: input, shape index: {}]   ;;  %s2768_s1 = inlined_call_operand.hbm [shape: f32[128,128], index: 1, kind: input, shape index: {}]   ;;  %s2769_s2 = inlined_call_operand.vmem [shape: f32[1,128], index: 2, kind: input, shape index: {}]   ;;  %s2770_s3 = inlined_call_operand.vmem [shape: f32[1,128], index: 3, kind: input, shape index: {}]   ;;  %s2771_s4 = inlined_call_operand.hbm [shape: f32[4,128], index: 4, kind: output, shape index: {}]  }
   0x1   :  { %10 = vsyncpa [#allocation6], 0 }
   0x2   :  { %11 = vsyncpa [#allocation4], 0  ;;  %s2084_s15 = smov [#allocation2]   ;;  %s2085_s17 = smov [#allocation5]  }
   0x3   :  { %s18_s16 = sshll.u32 %s2084_s15, 4  ;;  %s27_s18 = sshll.u32 %s2085_s17, 4  ;;  %s19_s16 = int_to_ptr.vmem [resolvable:$true] %s18_s16  ;;  %s28_s18 = int_to_ptr.vmem [resolvable:$true] %s27_s18 }
   0x4   :  { %s2026_s19 = scalar_lea.vmem %s19_s16, 64  ;;  %p2031_p1 = scmp.lt.s32.totalorder %s19_s16, %s19_s16 }
   0x5   :  { %p2027_p0 = scmp.ne.s32.totalorder %s19_s16, %s2026_s19  ;;  %p2032_p2 = scmp.lt.s32.totalorder %s2026_s19, %s2026_s19 }
   0x7   :  { %p2033_p3 = por %p2032_p2, %p2031_p1 }
   0x9   :  { %p2034_p4 = pnand %p2033_p3, %p2027_p0 }
   0xb   :  { %2037 = shalt.err (!%p2034_p4)
}
   0xc   :  { %21 = dma.hbm_to_vmem [thread:$0]  %s2767_s0, 64, %s19_s16, [#allocation3]  }
   0xd   :  { %s2046_s22 = scalar_lea.vmem %s28_s18, 2048  ;;  %p2051_p6 = scmp.lt.s32.totalorder %s28_s18, %s28_s18 }
   0xe   :  { %p2047_p5 = scmp.ne.s32.totalorder %s28_s18, %s2046_s22  ;;  %p2052_p7 = scmp.lt.s32.totalorder %s2046_s22, %s2046_s22 }
  0x10   :  { %p2053_p8 = por %p2052_p7, %p2051_p6 }
  0x12   :  { %p2054_p9 = pnand %p2053_p8, %p2047_p5 }
  0x14   :  { %2057 = shalt.err (!%p2054_p9)
}
  0x15   :  { %s2086_s23 = smov 128   ;;  %s2087_s24 = smov 8  }
  0x16   :  { %33 = dma.hbm_to_vmem [thread:$0]  %s2768_s1, 2048, %s28_s18, [#allocation6], %s2086_s23, %s2086_s23, %s2087_s24  }
  0x17   :  { %2078 = dma.done.wait [#allocation3], 64  }
  0x18   :  { %2079 = vsyncadd [#allocation3], 4294967232 }
  0x19   :  { %2080 = dma.done.wait [#allocation6], 2048  }
  0x1a   :  { %2081 = vsyncadd [#allocation6], 4294965248  ;;  %v2784_v0 = vmov 0.0   ;;  %vm2089_vm0 = vmmov 0   ;;  %v60_v1 = vld [vmem:[#allocation5 + $0x78] sm:$0xff]  ;;  %v59_v2 = vld [vmem:[#allocation5 + $0x70] sm:$0xff] }
  0x1b   :  { %1589 = vmatprep.subr.mxu0 %v2784_v0  ;;  %1624 = vmatprep.subr.mxu1 %v2784_v0  ;;  %v58_v3 = vld [vmem:[#allocation5 + $0x68] sm:$0xff]  ;;  %v2128_v4 = vand.u32 4294901760, %v60_v1  ;;  %v2130_v5 = vand.u32 4294901760, %v59_v2  ;;  %v57_v7 = vld [vmem:[#allocation5 + $0x60] sm:$0xff]  ;;  %v56_v8 = vld [vmem:[#allocation5 + $0x58] sm:$0xff]  ;;  %s2090_s29 = smov [#allocation7]  }
  0x1c   :  { %1621 = vmatprep.mubr.msk.f32.mxu0 %vm2089_vm0, %v2784_v0  ;;  %1656 = vmatprep.mubr.msk.f32.mxu1 %vm2089_vm0, %v2784_v0  ;;  %v2132_v6 = vand.u32 4294901760, %v58_v3  ;;  %v55_v9 = vld [vmem:[#allocation5 + $0x50] sm:$0xff]  ;;  %v2134_v10 = vand.u32 4294901760, %v57_v7  ;;  %v2136_v11 = vand.u32 4294901760, %v56_v8  ;;  %v54_v13 = vld [vmem:[#allocation5 + $0x48] sm:$0xff]  ;;  %v53_v14 = vld [vmem:[#allocation5 + $0x40] sm:$0xff] }
  0x1d   :  { %v2138_v12 = vand.u32 4294901760, %v55_v9  ;;  %1590 = vmatpush3.msra.mxu0 %v2128_v4  ;;  %v2142_v15 = vsub.f32 %v60_v1, %v2128_v4  ;;  %v2145_v16 = vsub.f32 %v59_v2, %v2130_v5  ;;  %v2147_v17 = vand.u32 4294901760, %v54_v13  ;;  %v52_v19 = vld [vmem:[#allocation5 + $0x38] sm:$0xff]  ;;  %v51_v26 = vld [vmem:[#allocation5 + $0x30] sm:$0xff]  ;;  %v50_v36 = vld [vmem:[#allocation5 + $0x28] sm:$0xff]  ;;  %s1373_s30 = sshll.u32 %s2090_s29, 4  ;;  %s1374_s30 = int_to_ptr.vmem [resolvable:$true] %s1373_s30 }
  0x1e   :  { %v2150_v18 = vsub.f32 %v58_v3, %v2132_v6  ;;  %1591 = vmatprep.subr.mxu0 %v2784_v0  ;;  %v2154_v20 = vsub.f32 %v57_v7, %v2134_v10  ;;  %v2157_v21 = vsub.f32 %v56_v8, %v2136_v11  ;;  %v2169_v25 = vand.u32 4294901760, %v53_v14  ;;  %v49_v41 = vld [vmem:[#allocation5 + $0x20] sm:$0xff]  ;;  %v48_v49 = vld [vmem:[#allocation5 + $0x18] sm:$0xff]  ;;  %v47_v54 = vld [vmem:[#allocation5 + $0x10] sm:$0xff]  ;;  %s2058_s5 = scalar_lea.vmem %s1374_s30, 64  ;;  %p2063_p11 = scmp.lt.s32.totalorder %s1374_s30, %s1374_s30 }
  0x1f   :  { %1592 = vmatpush3.msra.mxu0 %v2130_v5  ;;  %v2161_v22 = vand.u32 4294901760, %v2142_v15  ;;  %v2164_v23 = vand.u32 4294901760, %v2145_v16  ;;  %v2175_v28 = vand.u32 4294901760, %v52_v19  ;;  %v2181_v30 = vsub.f32 %v55_v9, %v2138_v12  ;;  %v2228_v50 = vld [vmem:[#allocation2] sm:$0xf]  ;;  %v46_v60 = vld [vmem:[#allocation5 + $0x8] sm:$0xff]  ;;  %p2059_p10 = scmp.ne.s32.totalorder %s1374_s30, %s2058_s5  ;;  %p2064_p12 = scmp.lt.s32.totalorder %s2058_s5, %s2058_s5 }
  0x20   :  { %v2167_v24 = vand.u32 4294901760, %v2150_v18  ;;  %1593 = vmatprep.subr.mxu0 %v2784_v0  ;;  %v2173_v27 = vand.u32 4294901760, %v2154_v20  ;;  %v2178_v29 = vand.u32 4294901760, %v2157_v21  ;;  %v2191_v34 = vsub.f32 %v54_v13, %v2147_v17  ;;  %2786 = vst [vmem:[#allocation11_spill] sm:$0xff] %v2228_v50  ;;  %v45_v7 = vld [vmem:[#allocation5] sm:$0xff] }
  0x21   :  { %1594 = vmatpush3.msra.mxu0 %v2132_v6  ;;  %v156_v31 = vsub.f32 %v2142_v15, %v2161_v22  ;;  %v163_v32 = vsub.f32 %v2145_v16, %v2164_v23  ;;  %v2194_v35 = vand.u32 4294901760, %v51_v26  ;;  %v2204_v40 = vand.u32 4294901760, %v2181_v30  ;;  %p2065_p13 = por %p2064_p12, %p2063_p11 }
  0x22   :  { %v170_v33 = vsub.f32 %v2150_v18, %v2167_v24  ;;  %1595 = vmatprep.subr.mxu0 %v2784_v0  ;;  %v177_v39 = vsub.f32 %v2154_v20, %v2173_v27  ;;  %v184_v42 = vsub.f32 %v2157_v21, %v2178_v29  ;;  %v2210_v43 = vsub.f32 %v53_v14, %v2169_v25 }
  0x23   :  { %1596 = vmatpush3.msra.mxu0 %v2134_v10  ;;  %v2197_v37 = vand.u32 4294901760, %v156_v31  ;;  %v2199_v38 = vand.u32 4294901760, %v163_v32  ;;  %v2216_v45 = vand.u32 4294901760, %v50_v36  ;;  %v2219_v46 = vand.u32 4294901760, %v2191_v34  ;;  %p2066_p0 = pnand %p2065_p13, %p2059_p10 }
  0x24   :  { %1597 = vmatprep.subr.mxu0 %v2784_v0  ;;  %v2214_v44 = vand.u32 4294901760, %v170_v33  ;;  %v2222_v47 = vsub.f32 %v52_v19, %v2175_v28  ;;  %v2226_v48 = vand.u32 4294901760, %v49_v41  ;;  %v2232_v51 = vand.u32 4294901760, %v177_v39 }
  0x25   :  { %1598 = vmatpush3.msra.mxu0 %v2136_v11  ;;  %1625 = vmatpush3.msra.mxu1 %v2197_v37  ;;  %v191_v52 = vsub.f32 %v2181_v30, %v2204_v40  ;;  %v2237_v53 = vand.u32 4294901760, %v2210_v43  ;;  %v2240_v55 = vsub.f32 %v51_v26, %v2194_v35  ;;  %v2244_v56 = vand.u32 4294901760, %v184_v42 }
  0x26   :  { %1599 = vmatprep.subr.mxu0 %v2784_v0  ;;  %1626 = vmatprep.subr.mxu1 %v2784_v0  ;;  %2787 = vst [vmem:[#allocation12_spill] sm:$0xff] %v2232_v51  ;;  %v2247_v57 = vand.u32 4294901760, %v2222_v47  ;;  %v198_v58 = vsub.f32 %v2191_v34, %v2219_v46  ;;  %v2253_v59 = vand.u32 4294901760, %v48_v49  ;;  %v2256_v61 = vsub.f32 %v50_v36, %v2216_v45 }
  0x27   :  { %1600 = vmatpush3.msra.mxu0 %v2138_v12  ;;  %1627 = vmatpush3.msra.mxu1 %v2199_v38  ;;  %2788 = vst [vmem:[#allocation13_spill] sm:$0xff] %v2244_v56  ;;  %v2259_v62 = vand.u32 4294901760, %v2228_v50  ;;  %v2263_v63 = vand.u32 4294901760, %v47_v54  ;;  %v2267_v1 = vand.u32 4294901760, %v191_v52  ;;  %v205_v2 = vsub.f32 %v2210_v43, %v2237_v53 }
  0x28   :  { %1601 = vmatprep.subr.mxu0 %v2784_v0  ;;  %1628 = vmatprep.subr.mxu1 %v2784_v0  ;;  %v2272_v3 = vand.u32 4294901760, %v2240_v55  ;;  %v2275_v8 = vsub.f32 %v49_v41, %v2226_v48  ;;  %v212_v9 = vsub.f32 %v2222_v47, %v2247_v57  ;;  %v2281_v13 = vand.u32 4294901760, %v46_v60 }
  0x29   :  { %1602 = vmatpush3.msra.mxu0 %v2147_v17  ;;  %1629 = vmatpush3.msra.mxu1 %v2214_v44  ;;  %2789 = vst [vmem:[#allocation14_spill] sm:$0xff] %v2267_v1  ;;  %v2285_v14 = vand.u32 4294901760, %v198_v58  ;;  %v2288_v19 = vand.u32 4294901760, %v2256_v61  ;;  %v2292_v26 = vsub.f32 %v2228_v50, %v2259_v62  ;;  %v2295_v31 = vsub.f32 %v48_v49, %v2253_v59 }
  0x2a   :  { %1603 = vmatprep.subr.mxu0 %v2784_v0  ;;  %1630 = vmatprep.subr.mxu1 %v2784_v0  ;;  %v2299_v32 = vand.u32 4294901760, %v45_v7  ;;  %v2303_v33 = vand.u32 4294901760, %v205_v2  ;;  %v219_v36 = vsub.f32 %v2240_v55, %v2272_v3  ;;  %v2308_v39 = vand.u32 4294901760, %v2275_v8 }
  0x2b   :  { %1604 = vmatpush3.msra.mxu0 %v2169_v25  ;;  %1631 = vmatpush3.msra.mxu1 %v2232_v51  ;;  %2790 = vst [vmem:[#allocation15_spill] sm:$0xff] %v2285_v14  ;;  %v2311_v41 = vsub.f32 %v47_v54, %v2263_v63  ;;  %v2315_v42 = vand.u32 4294901760, %v212_v9  ;;  %v226_v49 = vsub.f32 %v2256_v61, %v2288_v19  ;;  %v2323_v58 = vand.u32 4294901760, %v2295_v31 }
  0x2c   :  { %1605 = vmatprep.subr.mxu0 %v2784_v0  ;;  %1632 = vmatprep.subr.mxu1 %v2784_v0  ;;  %2791 = vst [vmem:[#allocation16_spill] sm:$0xff] %v2303_v33  ;;  %v2326_v54 = vsub.f32 %v46_v60, %v2281_v13  ;;  %v2332_v2 = vand.u32 4294901760, %v219_v36  ;;  %v233_v9 = vsub.f32 %v2275_v8, %v2308_v39  ;;  %v2796_v36 = vand.u32 4294901760, %v2292_v26 }
  0x2d   :  { %1606 = vmatpush3.msra.mxu0 %v2175_v28  ;;  %1633 = vmatpush3.msra.mxu1 %v2244_v56  ;;  %2792 = vst [vmem:[#allocation17_spill] sm:$0xff] %v2315_v42  ;;  %2793 = vst [vmem:[#allocation18_spill] sm:$0xff] %v2323_v58  ;;  %v2337_v52 = vand.u32 4294901760, %v2311_v41  ;;  %v2340_v50 = vsub.f32 %v45_v7, %v2299_v32  ;;  %v2346_v60 = vand.u32 4294901760, %v226_v49 }
  0x2e   :  { %1607 = vmatprep.subr.mxu0 %v2784_v0  ;;  %1634 = vmatprep.subr.mxu1 %v2784_v0  ;;  %2794 = vst [vmem:[#allocation19_spill] sm:$0xff] %v2332_v2  ;;  %v2354_v7 = vand.u32 4294901760, %v2326_v54  ;;  %v2360_v49 = vand.u32 4294901760, %v233_v9 }
  0x2f   :  { %1608 = vmatpush3.msra.mxu0 %v2194_v35  ;;  %1635 = vmatpush3.msra.mxu1 %v2267_v1  ;;  %2795 = vst [vmem:[#allocation20_spill] sm:$0xff] %v2337_v52 }
  0x30   :  { %1609 = vmatprep.subr.mxu0 %v2784_v0  ;;  %1636 = vmatprep.subr.mxu1 %v2784_v0  ;;  %2797 = vst [vmem:[#allocation21_spill] sm:$0xff] %v2354_v7  ;;  %v254_v9 = vsub.f32 %v2326_v54, %v2354_v7 }
  0x31   :  { %1610 = vmatpush3.msra.mxu0 %v2216_v45  ;;  %1637 = vmatpush3.msra.mxu1 %v2285_v14  ;;  %v240_v14 = vsub.f32 %v2295_v31, %v2323_v58 }
  0x32   :  { %1611 = vmatprep.subr.mxu0 %v2784_v0  ;;  %1638 = vmatprep.subr.mxu1 %v2784_v0 }
  0x33   :  { %1612 = vmatpush3.msra.mxu0 %v2226_v48  ;;  %1639 = vmatpush3.msra.mxu1 %v2303_v33  ;;  %v145_v33 = vsub.f32 %v2292_v26, %v2796_v36  ;;  %v2365_v36 = vand.u32 4294901760, %v2340_v50  ;;  %v2371_v56 = vand.u32 4294901760, %v240_v14  ;;  %v2386_v14 = vand.u32 4294901760, %v254_v9 }
  0x34   :  { %1613 = vmatprep.subr.mxu0 %v2784_v0  ;;  %1640 = vmatprep.subr.mxu1 %v2784_v0 }
  0x35   :  { %1614 = vmatpush3.msra.mxu0 %v2253_v59  ;;  %1641 = vmatpush3.msra.mxu1 %v2315_v42  ;;  %v247_v42 = vsub.f32 %v2311_v41, %v2337_v52  ;;  %2798 = vst [vmem:[#allocation22_spill] sm:$0xff] %v2365_v36  ;;  %v146_v1 = vand.u32 4294901760, %v145_v33  ;;  %v261_v51 = vsub.f32 %v2340_v50, %v2365_v36 }
  0x36   :  { %1615 = vmatprep.subr.mxu0 %v2784_v0  ;;  %1642 = vmatprep.subr.mxu1 %v2784_v0 }
  0x37   :  { %1616 = vmatpush3.msra.mxu0 %v2263_v63  ;;  %1643 = vmatpush3.msra.mxu1 %v2332_v2  ;;  %v2379_v2 = vand.u32 4294901760, %v247_v42  ;;  %v2392_v33 = vand.u32 4294901760, %v261_v51  ;;  %v2799_v51 = vand.u32 4294901760, %v2292_v26  ;;  %v2806_v42 = vld [vmem:[#allocation19_spill] sm:$0xff] }
  0x38   :  { %1617 = vmatprep.subr.mxu0 %v2784_v0  ;;  %1644 = vmatprep.subr.mxu1 %v2784_v0 }
  0x39   :  { %1618 = vmatpush3.msra.mxu0 %v2281_v13  ;;  %1645 = vmatpush3.msra.mxu1 %v2346_v60 }
  0x3a   :  { %1619 = vmatprep.subr.mxu0 %v2784_v0  ;;  %1646 = vmatprep.subr.mxu1 %v2784_v0 }
  0x3b   :  { %1620 = vmatpush3.msra.mxu0 %v2299_v32  ;;  %1647 = vmatpush3.msra.mxu1 %v2360_v49 }
  0x3c   :  { %1648 = vmatprep.subr.mxu1 %v2784_v0  ;;  %1659 = vmatprep.subr.mxu0 %v2784_v0 }
  0x3d   :  { %1622 = vmatmul.mubr.f32.vlgmr.msra.gmra.mxu0 %v146_v1  ;;  %1649 = vmatpush3.msra.mxu1 %v2371_v56  ;;  %v2804_v1 = vld [vmem:[#allocation16_spill] sm:$0xff] }
  0x3e   :  { %1660 = vmatpush3.msra.mxu0 %v2142_v15  ;;  %1650 = vmatprep.subr.mxu1 %v2784_v0 }
  0x3f   :  { %1661 = vmatprep.subr.mxu0 %v2784_v0  ;;  %1651 = vmatpush3.msra.mxu1 %v2379_v2 }
  0x40   :  { %1662 = vmatpush3.msra.mxu0 %v2145_v16  ;;  %1652 = vmatprep.subr.mxu1 %v2784_v0 }
  0x41   :  { %1663 = vmatprep.subr.mxu0 %v2784_v0  ;;  %1653 = vmatpush3.msra.mxu1 %v2386_v14 }
  0x42   :  { %1664 = vmatpush3.msra.mxu0 %v2150_v18  ;;  %1654 = vmatprep.subr.mxu1 %v2784_v0 }
  0x43   :  { %1665 = vmatprep.subr.mxu0 %v2784_v0  ;;  %1655 = vmatpush3.msra.mxu1 %v2392_v33 }
  0x44   :  { %1666 = vmatpush3.msra.mxu0 %v2154_v20  ;;  %1657 = vmatmul.mubr.f32.vlgmr.msra.gmra.mxu1 %v2259_v62 }
  0x45   :  { %1667 = vmatprep.subr.mxu0 %v2784_v0  ;;  %1694 = vmatprep.subr.mxu1 %v2784_v0 }
  0x46   :  { %1668 = vmatpush3.msra.mxu0 %v2157_v21  ;;  %1695 = vmatpush3.msra.mxu1 %v2128_v4 }
  0x47   :  { %1669 = vmatprep.subr.mxu0 %v2784_v0  ;;  %1696 = vmatprep.subr.mxu1 %v2784_v0 }
  0x48   :  { %1670 = vmatpush3.msra.mxu0 %v2181_v30  ;;  %1697 = vmatpush3.msra.mxu1 %v2130_v5 }
  0x49   :  { %1671 = vmatprep.subr.mxu0 %v2784_v0  ;;  %1698 = vmatprep.subr.mxu1 %v2784_v0 }
  0x4a   :  { %1672 = vmatpush3.msra.mxu0 %v2191_v34  ;;  %1699 = vmatpush3.msra.mxu1 %v2132_v6 }
  0x4b   :  { %1673 = vmatprep.subr.mxu0 %v2784_v0  ;;  %1700 = vmatprep.subr.mxu1 %v2784_v0 }
  0x4c   :  { %1674 = vmatpush3.msra.mxu0 %v2210_v43  ;;  %1701 = vmatpush3.msra.mxu1 %v2134_v10 }
  0x4d   :  { %1675 = vmatprep.subr.mxu0 %v2784_v0  ;;  %1702 = vmatprep.subr.mxu1 %v2784_v0 }
  0x4e   :  { %1676 = vmatpush3.msra.mxu0 %v2222_v47  ;;  %1703 = vmatpush3.msra.mxu1 %v2136_v11 }
  0x4f   :  { %1677 = vmatprep.subr.mxu0 %v2784_v0  ;;  %1704 = vmatprep.subr.mxu1 %v2784_v0 }
  0x50   :  { %1678 = vmatpush3.msra.mxu0 %v2240_v55  ;;  %1705 = vmatpush3.msra.mxu1 %v2138_v12 }
  0x51   :  { %1679 = vmatprep.subr.mxu0 %v2784_v0  ;;  %1706 = vmatprep.subr.mxu1 %v2784_v0 }
  0x52   :  { %1680 = vmatpush3.msra.mxu0 %v2256_v61  ;;  %1707 = vmatpush3.msra.mxu1 %v2147_v17 }
  0x53   :  { %1681 = vmatprep.subr.mxu0 %v2784_v0  ;;  %1708 = vmatprep.subr.mxu1 %v2784_v0 }
  0x54   :  { %1682 = vmatpush3.msra.mxu0 %v2275_v8  ;;  %1709 = vmatpush3.msra.mxu1 %v2169_v25 }
  0x55   :  { %1683 = vmatprep.subr.mxu0 %v2784_v0  ;;  %1710 = vmatprep.subr.mxu1 %v2784_v0 }
  0x56   :  { %1684 = vmatpush3.msra.mxu0 %v2295_v31  ;;  %1711 = vmatpush3.msra.mxu1 %v2175_v28 }
  0x57   :  { %1685 = vmatprep.subr.mxu0 %v2784_v0  ;;  %1712 = vmatprep.subr.mxu1 %v2784_v0 }
  0x58   :  { %1686 = vmatpush3.msra.mxu0 %v2311_v41  ;;  %1713 = vmatpush3.msra.mxu1 %v2194_v35 }
  0x59   :  { %1687 = vmatprep.subr.mxu0 %v2784_v0  ;;  %1714 = vmatprep.subr.mxu1 %v2784_v0 }
  0x5a   :  { %1688 = vmatpush3.msra.mxu0 %v2326_v54  ;;  %1715 = vmatpush3.msra.mxu1 %v2216_v45 }
  0x5b   :  { %1689 = vmatprep.subr.mxu0 %v2784_v0  ;;  %1716 = vmatprep.subr.mxu1 %v2784_v0 }
  0x5c   :  { %1690 = vmatpush3.msra.mxu0 %v2340_v50  ;;  %1691 = vmatprep.mubr.msk.f32.mxu0 %vm2089_vm0, %v2784_v0 }
  0x5d   :  { %1717 = vmatpush3.msra.mxu1 %v2226_v48  ;;  %1692 = vmatmul.mubr.f32.vlgmr.msra.gmra.mxu0 %v2292_v26  ;;  %v2805_v26 = vld [vmem:[#allocation17_spill] sm:$0xff] }
  0x5e   :  { %1718 = vmatprep.subr.mxu1 %v2784_v0  ;;  %1729 = vmatprep.subr.mxu0 %v2784_v0 }
  0x5f   :  { %1719 = vmatpush3.msra.mxu1 %v2253_v59  ;;  %1730 = vmatpush3.msra.mxu0 %v2161_v22 }
  0x60   :  { %1720 = vmatprep.subr.mxu1 %v2784_v0  ;;  %1731 = vmatprep.subr.mxu0 %v2784_v0 }
  0x61   :  { %1721 = vmatpush3.msra.mxu1 %v2263_v63  ;;  %1732 = vmatpush3.msra.mxu0 %v2164_v23 }
  0x62   :  { %1722 = vmatprep.subr.mxu1 %v2784_v0  ;;  %1733 = vmatprep.subr.mxu0 %v2784_v0 }
  0x63   :  { %1723 = vmatpush3.msra.mxu1 %v2281_v13  ;;  %1734 = vmatpush3.msra.mxu0 %v2167_v24 }
  0x64   :  { %1724 = vmatprep.subr.mxu1 %v2784_v0  ;;  %1735 = vmatprep.subr.mxu0 %v2784_v0 }
  0x65   :  { %1725 = vmatpush3.msra.mxu1 %v2299_v32  ;;  %1726 = vmatprep.mubr.msk.f32.mxu1 %vm2089_vm0, %v2784_v0 }
  0x66   :  { %1736 = vmatpush3.msra.mxu0 %v2173_v27  ;;  %1727 = vmatmul.mubr.f32.vlgmr.msra.gmra.mxu1 %v2799_v51 }
  0x67   :  { %1737 = vmatprep.subr.mxu0 %v2784_v0  ;;  %1764 = vmatprep.subr.mxu1 %v2784_v0 }
  0x68   :  { %1738 = vmatpush3.msra.mxu0 %v2178_v29  ;;  %1765 = vmatpush3.msra.mxu1 %v2128_v4 }
  0x69   :  { %1739 = vmatprep.subr.mxu0 %v2784_v0  ;;  %1766 = vmatprep.subr.mxu1 %v2784_v0 }
  0x6a   :  { %1740 = vmatpush3.msra.mxu0 %v2204_v40  ;;  %1767 = vmatpush3.msra.mxu1 %v2130_v5 }
  0x6b   :  { %1741 = vmatprep.subr.mxu0 %v2784_v0  ;;  %1768 = vmatprep.subr.mxu1 %v2784_v0 }
  0x6c   :  { %1742 = vmatpush3.msra.mxu0 %v2219_v46  ;;  %1769 = vmatpush3.msra.mxu1 %v2132_v6 }
  0x6d   :  { %1743 = vmatprep.subr.mxu0 %v2784_v0  ;;  %1770 = vmatprep.subr.mxu1 %v2784_v0 }
  0x6e   :  { %1744 = vmatpush3.msra.mxu0 %v2237_v53  ;;  %1771 = vmatpush3.msra.mxu1 %v2134_v10 }
  0x6f   :  { %1745 = vmatprep.subr.mxu0 %v2784_v0  ;;  %1772 = vmatprep.subr.mxu1 %v2784_v0 }
  0x70   :  { %1746 = vmatpush3.msra.mxu0 %v2247_v57  ;;  %1773 = vmatpush3.msra.mxu1 %v2136_v11 }
  0x71   :  { %1747 = vmatprep.subr.mxu0 %v2784_v0  ;;  %1774 = vmatprep.subr.mxu1 %v2784_v0 }
  0x72   :  { %1748 = vmatpush3.msra.mxu0 %v2272_v3  ;;  %1775 = vmatpush3.msra.mxu1 %v2138_v12 }
  0x73   :  { %1749 = vmatprep.subr.mxu0 %v2784_v0  ;;  %1776 = vmatprep.subr.mxu1 %v2784_v0 }
  0x74   :  { %1750 = vmatpush3.msra.mxu0 %v2288_v19  ;;  %1777 = vmatpush3.msra.mxu1 %v2147_v17 }
  0x75   :  { %1751 = vmatprep.subr.mxu0 %v2784_v0  ;;  %1778 = vmatprep.subr.mxu1 %v2784_v0 }
  0x76   :  { %1752 = vmatpush3.msra.mxu0 %v2308_v39  ;;  %1779 = vmatpush3.msra.mxu1 %v2169_v25 }
  0x77   :  { %1753 = vmatprep.subr.mxu0 %v2784_v0  ;;  %1780 = vmatprep.subr.mxu1 %v2784_v0 }
  0x78   :  { %1754 = vmatpush3.msra.mxu0 %v2323_v58  ;;  %1781 = vmatpush3.msra.mxu1 %v2175_v28  ;;  %v2807_v58 = vld [vmem:[#allocation11_spill] sm:$0xff] }
  0x79   :  { %1755 = vmatprep.subr.mxu0 %v2784_v0  ;;  %1782 = vmatprep.subr.mxu1 %v2784_v0 }
  0x7a   :  { %1756 = vmatpush3.msra.mxu0 %v2337_v52  ;;  %1783 = vmatpush3.msra.mxu1 %v2194_v35 }
  0x7b   :  { %1757 = vmatprep.subr.mxu0 %v2784_v0  ;;  %1784 = vmatprep.subr.mxu1 %v2784_v0 }
  0x7c   :  { %1758 = vmatpush3.msra.mxu0 %v2354_v7  ;;  %1785 = vmatpush3.msra.mxu1 %v2216_v45 }
  0x7d   :  { %1759 = vmatprep.subr.mxu0 %v2784_v0  ;;  %1786 = vmatprep.subr.mxu1 %v2784_v0 }
  0x7e   :  { %1760 = vmatpush3.msra.mxu0 %v2365_v36  ;;  %1761 = vmatprep.mubr.msk.f32.mxu0 %vm2089_vm0, %v2784_v0 }
  0x7f   :  { %1787 = vmatpush3.msra.mxu1 %v2226_v48  ;;  %1762 = vmatmul.mubr.f32.vlgmr.msra.gmra.mxu0 %v2259_v62 }
  0x80   :  { %1788 = vmatprep.subr.mxu1 %v2784_v0  ;;  %1796 = vmatprep.mubr.msk.f32.mxu1 %vm2089_vm0, %v2784_v0 }
  0x81   :  { %1789 = vmatpush3.msra.mxu1 %v2253_v59  ;;  %1799 = vmatprep.subr.mxu0 %v2784_v0 }
  0x82   :  { %1790 = vmatprep.subr.mxu1 %v2784_v0  ;;  %1800 = vmatpush3.msra.mxu0 %v2128_v4 }
  0x83   :  { %1791 = vmatpush3.msra.mxu1 %v2263_v63  ;;  %1801 = vmatprep.subr.mxu0 %v2784_v0 }
  0x84   :  { %1792 = vmatprep.subr.mxu1 %v2784_v0  ;;  %1802 = vmatpush3.msra.mxu0 %v2130_v5 }
  0x85   :  { %1793 = vmatpush3.msra.mxu1 %v2281_v13  ;;  %1803 = vmatprep.subr.mxu0 %v2784_v0 }
  0x86   :  { %1794 = vmatprep.subr.mxu1 %v2784_v0  ;;  %1804 = vmatpush3.msra.mxu0 %v2132_v6 }
  0x87   :  { %1795 = vmatpush3.msra.mxu1 %v2299_v32  ;;  %1805 = vmatprep.subr.mxu0 %v2784_v0 }
  0x88   :  { %1797 = vmatmul.mubr.f32.vlgmr.msra.gmra.mxu1 %v2259_v62  ;;  %1834 = vmatprep.subr.mxu1 %v2784_v0  ;;  %v2803_v62 = vld [vmem:[#allocation15_spill] sm:$0xff] }
  0x89   :  { %1835 = vmatpush3.msra.mxu1 %v2197_v37  ;;  %1806 = vmatpush3.msra.mxu0 %v2134_v10  ;;  %v2800_v37 = vld [vmem:[#allocation12_spill] sm:$0xff] }
  0x8a   :  { %1836 = vmatprep.subr.mxu1 %v2784_v0  ;;  %1807 = vmatprep.subr.mxu0 %v2784_v0 }
  0x8b   :  { %1837 = vmatpush3.msra.mxu1 %v2199_v38  ;;  %1808 = vmatpush3.msra.mxu0 %v2136_v11  ;;  %v2801_v38 = vld [vmem:[#allocation13_spill] sm:$0xff] }
  0x8c   :  { %1838 = vmatprep.subr.mxu1 %v2784_v0  ;;  %1809 = vmatprep.subr.mxu0 %v2784_v0 }
  0x8d   :  { %1839 = vmatpush3.msra.mxu1 %v2214_v44  ;;  %1810 = vmatpush3.msra.mxu0 %v2138_v12  ;;  %v2802_v44 = vld [vmem:[#allocation14_spill] sm:$0xff] }
  0x8e   :  { %1840 = vmatprep.subr.mxu1 %v2784_v0  ;;  %1811 = vmatprep.subr.mxu0 %v2784_v0 }
  0x8f   :  { %1841 = vmatpush3.msra.mxu1 %v2800_v37  ;;  %1812 = vmatpush3.msra.mxu0 %v2147_v17 }
  0x90   :  { %1842 = vmatprep.subr.mxu1 %v2784_v0  ;;  %1813 = vmatprep.subr.mxu0 %v2784_v0 }
  0x91   :  { %1843 = vmatpush3.msra.mxu1 %v2801_v38  ;;  %1814 = vmatpush3.msra.mxu0 %v2169_v25 }
  0x92   :  { %1844 = vmatprep.subr.mxu1 %v2784_v0  ;;  %1815 = vmatprep.subr.mxu0 %v2784_v0 }
  0x93   :  { %1845 = vmatpush3.msra.mxu1 %v2802_v44  ;;  %1816 = vmatpush3.msra.mxu0 %v2175_v28 }
  0x94   :  { %1846 = vmatprep.subr.mxu1 %v2784_v0  ;;  %1817 = vmatprep.subr.mxu0 %v2784_v0 }
  0x95   :  { %1847 = vmatpush3.msra.mxu1 %v2803_v62  ;;  %1818 = vmatpush3.msra.mxu0 %v2194_v35 }
  0x96   :  { %1848 = vmatprep.subr.mxu1 %v2784_v0  ;;  %1819 = vmatprep.subr.mxu0 %v2784_v0 }
  0x97   :  { %1849 = vmatpush3.msra.mxu1 %v2804_v1  ;;  %1820 = vmatpush3.msra.mxu0 %v2216_v45 }
  0x98   :  { %1850 = vmatprep.subr.mxu1 %v2784_v0  ;;  %1821 = vmatprep.subr.mxu0 %v2784_v0 }
  0x99   :  { %1851 = vmatpush3.msra.mxu1 %v2805_v26  ;;  %1822 = vmatpush3.msra.mxu0 %v2226_v48 }
  0x9a   :  { %1852 = vmatprep.subr.mxu1 %v2784_v0  ;;  %1823 = vmatprep.subr.mxu0 %v2784_v0 }
  0x9b   :  { %1853 = vmatpush3.msra.mxu1 %v2806_v42  ;;  %1866 = vmatprep.mubr.msk.f32.mxu1 %vm2089_vm0, %v2784_v0 }
  0x9c   :  { %1854 = vmatprep.subr.mxu1 %v2784_v0  ;;  %1824 = vmatpush3.msra.mxu0 %v2253_v59 }
  0x9d   :  { %1855 = vmatpush3.msra.mxu1 %v2346_v60  ;;  %1825 = vmatprep.subr.mxu0 %v2784_v0 }
  0x9e   :  { %1856 = vmatprep.subr.mxu1 %v2784_v0  ;;  %1826 = vmatpush3.msra.mxu0 %v2263_v63 }
  0x9f   :  { %1857 = vmatpush3.msra.mxu1 %v2360_v49  ;;  %1827 = vmatprep.subr.mxu0 %v2784_v0 }
  0xa0   :  { %1858 = vmatprep.subr.mxu1 %v2784_v0  ;;  %1828 = vmatpush3.msra.mxu0 %v2281_v13 }
  0xa1   :  { %1859 = vmatpush3.msra.mxu1 %v2371_v56  ;;  %1829 = vmatprep.subr.mxu0 %v2784_v0 }
  0xa2   :  { %1860 = vmatprep.subr.mxu1 %v2784_v0  ;;  %1830 = vmatpush3.msra.mxu0 %v2299_v32 }
  0xa3   :  { %1861 = vmatpush3.msra.mxu1 %v2379_v2  ;;  %1831 = vmatprep.mubr.msk.f32.mxu0 %vm2089_vm0, %v2784_v0 }
  0xa4   :  { %1862 = vmatprep.subr.mxu1 %v2784_v0  ;;  %1869 = vmatprep.subr.mxu0 %v2784_v0 }
  0xa5   :  { %1863 = vmatpush3.msra.mxu1 %v2386_v14 }
  0xa6   :  { %1864 = vmatprep.subr.mxu1 %v2784_v0 }
  0xa7   :  { %1865 = vmatpush3.msra.mxu1 %v2392_v33 }
  0xa8   :  { %1904 = vmatprep.subr.mxu1 %v2784_v0 }
  0xfd   :  { %v148_v56 = vpop.f32.mrf.mxu0 }
  0xff   :  { %v1623_v60 = vpop.f32.mrf.mxu0 }
 0x104   :  { %v299_v49 = vpop.f32.mrf.mxu1 }
 0x105   :  { %v300_v62 = vadd.f32 %v299_v49, %v148_v56  ;;  %v2808_v56 = vmov 0.0  }
 0x106   :  { %v1658_v9 = vpop.f32.mrf.mxu1 }
 0x11d   :  { %v403_v2 = vpop.f32.mrf.mxu0 }
 0x11e   :  { %v404_v26 = vadd.f32 %v403_v2, %v300_v62 }
 0x11f   :  { %v1693_v51 = vpop.f32.mrf.mxu0 }
 0x126   :  { %v492_v37 = vpop.f32.mrf.mxu1 }
 0x127   :  { %v493_v42 = vadd.f32 %v492_v37, %v404_v26 }
 0x128   :  { %v1728_v38 = vpop.f32.mrf.mxu1 }
 0x13f   :  { %v611_v44 = vpop.f32.mrf.mxu0 }
 0x140   :  { %v612_v14 = vadd.f32 %v611_v44, %v493_v42 }
 0x141   :  { %v1763_v1 = vpop.f32.mrf.mxu0 }
 0x148   :  { %v698_v36 = vpop.f32.mrf.mxu1 }
 0x149   :  { %v699_v7 = vadd.f32 %v698_v36, %v612_v14 }
 0x14a   :  { %v1798_v52 = vpop.f32.mrf.mxu1 }
 0x14b   :  { %v702_v33 = vmul.f32 0.03125, %v699_v7 }
 0x14d   :  { %v2608_v0 = vsub.f32 %v2807_v58, %v702_v33 }
 0x14f   :  { %v704_v60 = vmul.f32 %v2608_v0, %v2608_v0 }
 0x151   :  { %v2612_v9 = vand.u32 4294901760, %v704_v60 }
 0x153   :  { %v2615_v51 = vsub.f32 %v704_v60, %v2612_v9  ;;  %1867 = vmatmul.mubr.f32.vlgmr.msra.gmra.mxu1 %v2612_v9 }
 0x154   :  { %1905 = vmatpush3.msra.mxu1 %v2128_v4  ;;  %1936 = vmatprep.mubr.msk.f32.mxu1 %vm2089_vm0, %v2808_v56 }
 0x155   :  { %1906 = vmatprep.subr.mxu1 %v2808_v56  ;;  %v788_v52 = vand.u32 4294901760, %v2615_v51 }
 0x156   :  { %1907 = vmatpush3.msra.mxu1 %v2130_v5 }
 0x157   :  { %1908 = vmatprep.subr.mxu1 %v2808_v56  ;;  %v789_v58 = vsub.f32 %v2615_v51, %v788_v52 }
 0x158   :  { %1909 = vmatpush3.msra.mxu1 %v2132_v6 }
 0x159   :  { %1910 = vmatprep.subr.mxu1 %v2808_v56  ;;  %v790_v7 = vand.u32 4294901760, %v789_v58 }
 0x15a   :  { %1911 = vmatpush3.msra.mxu1 %v2134_v10 }
 0x15b   :  { %1912 = vmatprep.subr.mxu1 %v2808_v56  ;;  %1832 = vmatmul.mubr.f32.vlgmr.msra.gmra.mxu0 %v790_v7 }
 0x15c   :  { %1870 = vmatpush3.msra.mxu0 %v2142_v15  ;;  %1913 = vmatpush3.msra.mxu1 %v2136_v11 }
 0x15d   :  { %1871 = vmatprep.subr.mxu0 %v2808_v56  ;;  %1914 = vmatprep.subr.mxu1 %v2808_v56 }
 0x15e   :  { %1872 = vmatpush3.msra.mxu0 %v2145_v16  ;;  %1915 = vmatpush3.msra.mxu1 %v2138_v12 }
 0x15f   :  { %1873 = vmatprep.subr.mxu0 %v2808_v56  ;;  %1916 = vmatprep.subr.mxu1 %v2808_v56 }
 0x160   :  { %1874 = vmatpush3.msra.mxu0 %v2150_v18  ;;  %1917 = vmatpush3.msra.mxu1 %v2147_v17 }
 0x161   :  { %1875 = vmatprep.subr.mxu0 %v2808_v56  ;;  %1918 = vmatprep.subr.mxu1 %v2808_v56 }
 0x162   :  { %1876 = vmatpush3.msra.mxu0 %v2154_v20  ;;  %1919 = vmatpush3.msra.mxu1 %v2169_v25 }
 0x163   :  { %1877 = vmatprep.subr.mxu0 %v2808_v56  ;;  %1920 = vmatprep.subr.mxu1 %v2808_v56 }
 0x164   :  { %1878 = vmatpush3.msra.mxu0 %v2157_v21  ;;  %1921 = vmatpush3.msra.mxu1 %v2175_v28 }
 0x165   :  { %1879 = vmatprep.subr.mxu0 %v2808_v56  ;;  %1922 = vmatprep.subr.mxu1 %v2808_v56 }
 0x166   :  { %1880 = vmatpush3.msra.mxu0 %v2181_v30  ;;  %1923 = vmatpush3.msra.mxu1 %v2194_v35 }
 0x167   :  { %1881 = vmatprep.subr.mxu0 %v2808_v56  ;;  %1924 = vmatprep.subr.mxu1 %v2808_v56 }
 0x168   :  { %1882 = vmatpush3.msra.mxu0 %v2191_v34  ;;  %1925 = vmatpush3.msra.mxu1 %v2216_v45 }
 0x169   :  { %1883 = vmatprep.subr.mxu0 %v2808_v56  ;;  %1926 = vmatprep.subr.mxu1 %v2808_v56 }
 0x16a   :  { %1884 = vmatpush3.msra.mxu0 %v2210_v43  ;;  %1927 = vmatpush3.msra.mxu1 %v2226_v48 }
 0x16b   :  { %1885 = vmatprep.subr.mxu0 %v2808_v56  ;;  %1928 = vmatprep.subr.mxu1 %v2808_v56 }
 0x16c   :  { %1886 = vmatpush3.msra.mxu0 %v2222_v47  ;;  %1929 = vmatpush3.msra.mxu1 %v2253_v59  ;;  %v1384_v47 = vld [vmem:[%s2770_s3] ss:$0 sm:$0xff] }
 0x16d   :  { %1887 = vmatprep.subr.mxu0 %v2808_v56  ;;  %1930 = vmatprep.subr.mxu1 %v2808_v56 }
 0x16e   :  { %1888 = vmatpush3.msra.mxu0 %v2240_v55  ;;  %1931 = vmatpush3.msra.mxu1 %v2263_v63 }
 0x16f   :  { %1889 = vmatprep.subr.mxu0 %v2808_v56  ;;  %1932 = vmatprep.subr.mxu1 %v2808_v56 }
 0x170   :  { %1890 = vmatpush3.msra.mxu0 %v2256_v61  ;;  %1933 = vmatpush3.msra.mxu1 %v2281_v13 }
 0x171   :  { %1891 = vmatprep.subr.mxu0 %v2808_v56  ;;  %1934 = vmatprep.subr.mxu1 %v2808_v56 }
 0x172   :  { %1892 = vmatpush3.msra.mxu0 %v2275_v8  ;;  %1935 = vmatpush3.msra.mxu1 %v2299_v32 }
 0x173   :  { %1893 = vmatprep.subr.mxu0 %v2808_v56  ;;  %1937 = vmatmul.mubr.f32.vlgmr.msra.gmra.mxu1 %v788_v52 }
 0x174   :  { %1974 = vmatprep.subr.mxu1 %v2808_v56  ;;  %1894 = vmatpush3.msra.mxu0 %v2295_v31 }
 0x175   :  { %1975 = vmatpush3.msra.mxu1 %v2128_v4  ;;  %1895 = vmatprep.subr.mxu0 %v2808_v56  ;;  %v2809_v4 = vld [vmem:[#allocation18_spill] sm:$0xff] }
 0x176   :  { %1976 = vmatprep.subr.mxu1 %v2808_v56  ;;  %1896 = vmatpush3.msra.mxu0 %v2311_v41 }
 0x177   :  { %1977 = vmatpush3.msra.mxu1 %v2130_v5  ;;  %1897 = vmatprep.subr.mxu0 %v2808_v56  ;;  %v2810_v5 = vld [vmem:[#allocation20_spill] sm:$0xff] }
 0x178   :  { %1978 = vmatprep.subr.mxu1 %v2808_v56  ;;  %1898 = vmatpush3.msra.mxu0 %v2326_v54 }
 0x179   :  { %1979 = vmatpush3.msra.mxu1 %v2132_v6  ;;  %1899 = vmatprep.subr.mxu0 %v2808_v56  ;;  %v2811_v6 = vld [vmem:[#allocation21_spill] sm:$0xff] }
 0x17a   :  { %1980 = vmatprep.subr.mxu1 %v2808_v56  ;;  %1900 = vmatpush3.msra.mxu0 %v2340_v50 }
 0x17b   :  { %1901 = vmatprep.mubr.msk.f32.mxu0 %vm2089_vm0, %v2808_v56  ;;  %1981 = vmatpush3.msra.mxu1 %v2134_v10  ;;  %v2812_v10 = vld [vmem:[#allocation22_spill] sm:$0xff] }
 0x17c   :  { %1902 = vmatmul.mubr.f32.vlgmr.msra.gmra.mxu0 %v2615_v51  ;;  %1939 = vmatprep.subr.mxu0 %v2808_v56 }
 0x17d   :  { %1982 = vmatprep.subr.mxu1 %v2808_v56  ;;  %1940 = vmatpush3.msra.mxu0 %v2161_v22 }
 0x17e   :  { %1983 = vmatpush3.msra.mxu1 %v2136_v11  ;;  %1941 = vmatprep.subr.mxu0 %v2808_v56 }
 0x17f   :  { %1984 = vmatprep.subr.mxu1 %v2808_v56  ;;  %1942 = vmatpush3.msra.mxu0 %v2164_v23 }
 0x180   :  { %1985 = vmatpush3.msra.mxu1 %v2138_v12  ;;  %1943 = vmatprep.subr.mxu0 %v2808_v56 }
 0x181   :  { %1986 = vmatprep.subr.mxu1 %v2808_v56  ;;  %1944 = vmatpush3.msra.mxu0 %v2167_v24 }
 0x182   :  { %1987 = vmatpush3.msra.mxu1 %v2147_v17  ;;  %1945 = vmatprep.subr.mxu0 %v2808_v56 }
 0x183   :  { %1988 = vmatprep.subr.mxu1 %v2808_v56  ;;  %1946 = vmatpush3.msra.mxu0 %v2173_v27 }
 0x184   :  { %1989 = vmatpush3.msra.mxu1 %v2169_v25  ;;  %1947 = vmatprep.subr.mxu0 %v2808_v56 }
 0x185   :  { %1990 = vmatprep.subr.mxu1 %v2808_v56  ;;  %1948 = vmatpush3.msra.mxu0 %v2178_v29 }
 0x186   :  { %1991 = vmatpush3.msra.mxu1 %v2175_v28  ;;  %1949 = vmatprep.subr.mxu0 %v2808_v56 }
 0x187   :  { %1992 = vmatprep.subr.mxu1 %v2808_v56  ;;  %1950 = vmatpush3.msra.mxu0 %v2204_v40 }
 0x188   :  { %1993 = vmatpush3.msra.mxu1 %v2194_v35  ;;  %1951 = vmatprep.subr.mxu0 %v2808_v56 }
 0x189   :  { %1994 = vmatprep.subr.mxu1 %v2808_v56  ;;  %1952 = vmatpush3.msra.mxu0 %v2219_v46 }
 0x18a   :  { %1995 = vmatpush3.msra.mxu1 %v2216_v45  ;;  %1953 = vmatprep.subr.mxu0 %v2808_v56  ;;  %v1383_v45 = vld [vmem:[%s2769_s2] ss:$0 sm:$0xff] }
 0x18b   :  { %1996 = vmatprep.subr.mxu1 %v2808_v56  ;;  %1954 = vmatpush3.msra.mxu0 %v2237_v53 }
 0x18c   :  { %1997 = vmatpush3.msra.mxu1 %v2226_v48  ;;  %1955 = vmatprep.subr.mxu0 %v2808_v56 }
 0x18d   :  { %1998 = vmatprep.subr.mxu1 %v2808_v56  ;;  %1956 = vmatpush3.msra.mxu0 %v2247_v57 }
 0x18e   :  { %1999 = vmatpush3.msra.mxu1 %v2253_v59  ;;  %1957 = vmatprep.subr.mxu0 %v2808_v56 }
 0x18f   :  { %2000 = vmatprep.subr.mxu1 %v2808_v56  ;;  %1958 = vmatpush3.msra.mxu0 %v2272_v3 }
 0x190   :  { %2001 = vmatpush3.msra.mxu1 %v2263_v63  ;;  %1959 = vmatprep.subr.mxu0 %v2808_v56 }
 0x191   :  { %2002 = vmatprep.subr.mxu1 %v2808_v56  ;;  %1960 = vmatpush3.msra.mxu0 %v2288_v19 }
 0x192   :  { %2003 = vmatpush3.msra.mxu1 %v2281_v13  ;;  %1961 = vmatprep.subr.mxu0 %v2808_v56 }
 0x193   :  { %2004 = vmatprep.subr.mxu1 %v2808_v56  ;;  %1962 = vmatpush3.msra.mxu0 %v2308_v39 }
 0x194   :  { %2005 = vmatpush3.msra.mxu1 %v2299_v32  ;;  %2006 = vmatprep.mubr.msk.f32.mxu1 %vm2089_vm0, %v2808_v56 }
 0x195   :  { %1963 = vmatprep.subr.mxu0 %v2808_v56  ;;  %2007 = vmatmul.mubr.f32.vlgmr.msra.gmra.mxu1 %v2612_v9 }
 0x196   :  { %1964 = vmatpush3.msra.mxu0 %v2809_v4  ;;  %1971 = vmatprep.mubr.msk.f32.mxu0 %vm2089_vm0, %v2808_v56 }
 0x197   :  { %1965 = vmatprep.subr.mxu0 %v2808_v56 }
 0x198   :  { %1966 = vmatpush3.msra.mxu0 %v2810_v5 }
 0x199   :  { %1967 = vmatprep.subr.mxu0 %v2808_v56 }
 0x19a   :  { %1968 = vmatpush3.msra.mxu0 %v2811_v6 }
 0x19b   :  { %1969 = vmatprep.subr.mxu0 %v2808_v56 }
 0x19c   :  { %1970 = vmatpush3.msra.mxu0 %v2812_v10 }
 0x19d   :  { %1972 = vmatmul.mubr.f32.vlgmr.msra.gmra.mxu0 %v2612_v9 }
 0x213   :  { %v943_v11 = vpop.f32.mrf.mxu1 }
 0x215   :  { %v1868_v12 = vpop.f32.mrf.mxu1 }
 0x21b   :  { %v792_v15 = vpop.f32.mrf.mxu0 }
 0x21c   :  { %v944_v23 = vadd.f32 %v943_v11, %v792_v15 }
 0x21d   :  { %v1833_v16 = vpop.f32.mrf.mxu0 }
 0x233   :  { %v1136_v17 = vpop.f32.mrf.mxu1 }
 0x235   :  { %v1938_v18 = vpop.f32.mrf.mxu1 }
 0x23c   :  { %v1047_v20 = vpop.f32.mrf.mxu0 }
 0x23d   :  { %v1048_v25 = vadd.f32 %v1047_v20, %v944_v23 }
 0x23e   :  { %v1903_v21 = vpop.f32.mrf.mxu0 }
 0x23f   :  { %v1137_v27 = vadd.f32 %v1136_v17, %v1048_v25 }
 0x255   :  { %v1342_v22 = vpop.f32.mrf.mxu1 }
 0x257   :  { %v2008_v24 = vpop.f32.mrf.mxu1 }
 0x25d   :  { %v1255_v28 = vpop.f32.mrf.mxu0 }
 0x25e   :  { %v1256_v29 = vadd.f32 %v1255_v28, %v1137_v27 }
 0x25f   :  { %v1973_v30 = vpop.f32.mrf.mxu0 }
 0x260   :  { %v1343_v34 = vadd.f32 %v1342_v22, %v1256_v29 }
 0x262   :  { %v1346_v35 = vmul.f32 0.03125, %v1343_v34 }
 0x264   :  { %2016 = vrsqrt.f32 %v1346_v35 }
 0x271   :  { %v2017_v40 = vpop.eup %2016 }
 0x272   :  { %v1348_v43 = vmin.f32 %v2017_v40, 100000.0 }
 0x274   :  { %v1349_v46 = vmul.f32 %v1348_v43, %v2608_v0 }
 0x276   :  { %v1357_v48 = vmul.f32 %v1383_v45, %v1349_v46 }
 0x278   :  { %v1365_v50 = vadd.f32 %v1384_v47, %v1357_v48 }
 0x27a   :  { %1366 = vst [vmem:[#allocation7] sm:$0xf] %v1365_v50 }
 0x27b   :  { %2069 = shalt.err (!%p2066_p0)
}
 0x27c   :  { %1376 = dma.vmem_to_hbm [thread:$0]  %s1374_s30, 64, %s2771_s4, [#allocation4]  }
 0x27d   :  { %2082 = dma.done.wait [#allocation4], 64  }
 0x27e   :  { %2083 = vsyncadd [#allocation4], 4294967232 }
 0x27f   :  { %1380 = vsyncpa [#allocation3], 1 }
 0x280   :  { %1381 = vsyncpa [#allocation6], 1 }
 0x281   :  { %1382 = vsyncpa [#allocation4], 1 }

</bundles_post_ra>
